<compile_context>
chip_gen: v6e
topology: v6e:2x2x1
jax: 0.10.0
libtpu: 0.0.40
codegen_flags: <defaults>
</compile_context>

<pallas_src>
import jax
import jax.numpy as jnp
from jax.experimental import pallas as pl
from jax.experimental.pallas import tpu as pltpu

LN_EPS = 1e-5  # torch.nn.LayerNorm default


# ---------------------------------------------------------------------------
# Kernel: CFConv partial sums on the lane-folded layout.
# ---------------------------------------------------------------------------
def _make_kernel(tile_jg: int):
    """Block shapes seen by the kernel:
         ln_ref   : (1, NJG, GH)            resident per batch element
         mask_ref : (1, TILE_I, TILE_JG, GH) the HBM-bound stream
         out_ref  : (1, TILE_I, GH) f32     resident across the j (reduction) axis
    """

    def kernel(ln_ref, mask_ref, out_ref):
        j = pl.program_id(2)

        @pl.when(j == 0)
        def _init():
            out_ref[...] = jnp.zeros_like(out_ref)

        # Slice the resident ln block at the current neighbour tile.
        j0 = pl.multiple_of(j * tile_jg, tile_jg)
        ln = ln_ref[0, pl.ds(j0, tile_jg)].astype(jnp.float32)     # (TILE_JG, GH)
        m = mask_ref[0].astype(jnp.float32)                        # (TILE_I, TILE_JG, GH)
        # VPU multiply + sublane reduce, accumulated in f32 in the output block.
        out_ref[...] += jnp.sum(m * ln[None, :, :], axis=1)[None]  # (1, TILE_I, GH)

    return kernel


# ---------------------------------------------------------------------------
# Tiling helpers
# ---------------------------------------------------------------------------
def _tile_candidates(dim: int, sub: int):
    """Legal tile sizes: multiples of `sub` dividing dim, plus dim itself."""
    cands = [t for t in range(sub, dim, sub) if dim % t == 0]
    cands.append(dim)
    return cands


def _largest_at_most(cands, limit):
    ok = [t for t in cands if t <= limit]
    return max(ok) if ok else min(cands)


def _pick_fold(hid_dim: int, n: int) -> int:
    """Largest G with G*hid_dim <= 128 and n % G == 0 (G = 1 if none)."""
    g = max(1, 128 // hid_dim) if hid_dim < 128 else 1
    while g > 1 and n % g != 0:
        g -= 1
    return g


def _choose_tiles(batch, n, njg, gh, itemsize, budget, sub):
    """Pick (tile_i, tile_jg) so the mask block is ~budget bytes per buffer."""
    i_cands = _tile_candidates(n, sub)
    j_cands = _tile_candidates(njg, sub)
    row_bytes = njg * gh * itemsize               # one output row, all neighbours
    if min(i_cands) * row_bytes <= budget:
        tile_jg = njg                             # whole j axis: single reduction step
        tile_i = _largest_at_most(i_cands, budget // row_bytes)
    else:
        tile_i = min(i_cands)
        tile_jg = _largest_at_most(
            j_cands, max(1, budget // (tile_i * gh * itemsize)))
    # Megacore: with a single batch element, keep >= 2 "parallel" i-blocks so
    # both v7x TensorCores stream the mask.
    if batch == 1 and tile_i == n:
        smaller = [t for t in i_cands if t <= n // 2]
        if smaller:
            tile_i = max(smaller)
    return tile_i, tile_jg


# ---------------------------------------------------------------------------
# Wrapper
# ---------------------------------------------------------------------------
def neighbor_emb(z, s, mask, emb_table, gamma=None, beta=None, *,
                 ln_emb=True,
                 block_bytes=12 * 1024 * 1024,
                 vmem_limit_bytes=48 * 1024 * 1024):
    """NeighborEmb forward. z:(B,N) int32, s:(B,N,H), mask:(B,N,N,H)."""
    B, N = z.shape
    H = s.shape[-1]
    assert mask.shape == (B, N, N, H), (mask.shape, (B, N, N, H))

    # --- O(B*N*H) prep in plain JAX (one fused pass; ~1/N of the mask traffic).
    # nn.Embedding forward is a plain table lookup; padding_idx=0 only affects
    # init/grad, so we take emb_table as given (PyTorch keeps row 0 at zero).
    emb = jnp.take(emb_table, z, axis=0).astype(jnp.float32)        # (B, N, H)
    if ln_emb:
        mean = jnp.mean(emb, axis=-1, keepdims=True)
        ctr = emb - mean
        var = jnp.mean(ctr * ctr, axis=-1, keepdims=True)
        ln = ctr * jax.lax.rsqrt(var + LN_EPS)
        if gamma is not None:
            ln = ln * gamma
        if beta is not None:
            ln = ln + beta
    else:
        ln = emb
    # bf16 mask => bf16 ln (halves the HBM streams); accumulation stays f32.
    ln = ln.astype(mask.dtype)

    itemsize = mask.dtype.itemsize
    sub = {4: 8, 2: 16, 1: 32}.get(itemsize, 8)   # sublane multiple per dtype packing

    # Per-buffer budget: 2 pipeline buffers (input dtype) + a possible
    # full-block f32 `m*ln` temp, with ~15% headroom for ln/out blocks.
    cap = int(vmem_limit_bytes * 0.85 / (2.0 + 4.0 / itemsize))
    budget = max(1, min(block_bytes, cap))

    def plan(n):
        g = _pick_fold(H, n)
        njg, gh = n // g, g * H
        ti, tj = _choose_tiles(B, n, njg, gh, itemsize, budget, sub)
        return g, njg, gh, ti, tj

    Np, mask_in = N, mask
    G, NJG, GH, tile_i, tile_jg = plan(N)
    if tile_i * tile_jg * GH * itemsize > cap:
        # No divisor-based tiling fits scoped VMEM (awkward N): zero-pad N so
        # clean sublane-multiple tiles exist (costs one mask copy, fallback only).
        # TODO(synk): grid padding (pl.cdiv grid + in-kernel tail masking) would avoid the copy.
        g_max = max(1, 128 // H) if H < 128 else 1
        step = g_max * sub
        Np = ((N + step - 1) // step) * step
        pad = Np - N
        mask_in = jnp.pad(mask, ((0, 0), (0, pad), (0, pad), (0, 0)))
        ln = jnp.pad(ln, ((0, 0), (0, pad), (0, 0)))
        G, NJG, GH, tile_i, tile_jg = plan(Np)

    # Lane-density fold: pack G consecutive neighbours into the lane axis.
    # Both reshapes merge contiguous minor dims -> free layout plumbing.
    mask_f = mask_in.reshape(B, Np, NJG, GH)
    ln_f = ln.reshape(B, NJG, GH)

    grid = (B, Np // tile_i, NJG // tile_jg)

    cost = pl.CostEstimate(
        flops=2 * B * Np * Np * H,
        transcendentals=0,
        bytes_accessed=(mask_f.size * itemsize + ln_f.size * itemsize
                        + B * Np * GH * 4),
    )

    acc = pl.pallas_call(
        _make_kernel(tile_jg),
        out_shape=jax.ShapeDtypeStruct((B, Np, GH), jnp.float32),
        grid_spec=pltpu.PrefetchScalarGridSpec(
            num_scalar_prefetch=0,
            grid=grid,
            in_specs=[
                # ln: resident for a whole batch element (fetched once per b);
                # sliced at the current j-tile in-kernel -> no redundant DMA
                # even when the reduction axis is tiled.
                pl.BlockSpec((1, NJG, GH), lambda b, i, j: (b, 0, 0)),
                # mask: the HBM-bound stream, ~budget bytes per grid step.
                pl.BlockSpec((1, tile_i, tile_jg, GH), lambda b, i, j: (b, i, j, 0)),
            ],
            # f32 accumulator lives in the output block (resident across j).
            out_specs=pl.BlockSpec((1, tile_i, GH), lambda b, i, j: (b, i, 0)),
        ),
        compiler_params=pltpu.CompilerParams(
            dimension_semantics=("parallel", "parallel", "arbitrary"),
            vmem_limit_bytes=vmem_limit_bytes),
        cost_estimate=cost,
    )(ln_f, mask_f)

    # Tiny O(B*N*GH) epilogue: sum the G folded neighbour groups and add the
    # residual (negligible vs. the (B,N,N,H) mask traffic).
    s_nb = acc.reshape(B, Np, G, H).sum(axis=2)[:, :N]
    return (s + s_nb).astype(s.dtype)


# ---------------------------------------------------------------------------
# Pure-JAX reference (module semantics) and tests
# ---------------------------------------------------------------------------
def neighbor_emb_ref(z, s, mask, emb_table, gamma, beta):
    emb = jnp.take(emb_table, z, axis=0)
    mean = jnp.mean(emb, axis=-1, keepdims=True)
    ctr = emb - mean
    var = jnp.mean(ctr * ctr, axis=-1, keepdims=True)
    ln = ctr * jax.lax.rsqrt(var + LN_EPS) * gamma + beta
    s_nb = jnp.sum(mask.astype(jnp.float32) * ln[:, None, :, :], axis=2)
    return s + s_nb


def _run_case(key, B, N, H, max_z, *, mask_dtype=jnp.float32,
              block_bytes=12 * 1024 * 1024, atol=1e-4, rtol=1e-4):
    kz, ks, km, ke, kg, kb = jax.random.split(key, 6)
    z = jax.random.randint(kz, (B, N), 1, max_z).astype(jnp.int32)
    s = jax.random.normal(ks, (B, N, H), dtype=jnp.float32)
    mask = jax.random.normal(km, (B, N, N, H), dtype=jnp.float32).astype(mask_dtype)
    emb_table = jax.random.normal(ke, (max_z, H), dtype=jnp.float32)
    emb_table = emb_table.at[0].set(0.0)            # nn.Embedding padding_idx=0 init
    gamma = 1.0 + 0.1 * jax.random.normal(kg, (H,), dtype=jnp.float32)
    beta = 0.1 * jax.random.normal(kb, (H,), dtype=jnp.float32)

    out = jax.block_until_ready(
        neighbor_emb(z, s, mask, emb_table, gamma, beta, block_bytes=block_bytes))
    ref = neighbor_emb_ref(z, s, mask, emb_table, gamma, beta)
    assert out.shape == (B, N, H)
    assert out.dtype == s.dtype
    assert jnp.allclose(out, ref, atol=atol, rtol=rtol), (
        f"mismatch vs reference for B={B} N={N} H={H} dtype={jnp.dtype(mask_dtype)}")


if __name__ == "__main__":
    root = jax.random.PRNGKey(0)
    k1, k2, k3, k4 = jax.random.split(root, 4)

    # 1) Small shape implied by the module; H=32 exercises the G=4 lane fold.
    _run_case(k1, B=2, N=8, H=32, max_z=10)

    # 2) Tiny block budget forces i- AND j-tiling (grid (2,8,2)): checks the
    #    resident-ln dynamic slice and the j-axis output accumulation.
    _run_case(k2, B=2, N=64, H=32, max_z=10, block_bytes=32 * 1024)

    # 3) Already lane-dense H (G=1) + single-batch megacore split (grid (1,2,1)).
    _run_case(k3, B=1, N=16, H=128, max_z=10)

    # 4) bf16 mask/ln path with a non-power-of-two fold (H=48 -> G=2, GH=96).
    _run_case(k4, B=1, N=32, H=48, max_z=10, mask_dtype=jnp.bfloat16,
              atol=2e-1, rtol=1e-1)

    print("KERNEL_OK")
</pallas_src>

<mosaic_0001>
module attributes {stable_mosaic.version = 11 : i64} {
  func.func @kernel(%arg0: i32, %arg1: i32, %arg2: i32, %arg3: memref<1x2x128xf32, #tpu.memory_space<vmem>>, %arg4: memref<1x8x2x128xf32, #tpu.memory_space<vmem>>, %arg5: memref<1x8x128xf32, #tpu.memory_space<vmem>>) attributes {dimension_semantics = [#tpu.dimension_semantics<parallel>, #tpu.dimension_semantics<parallel>, #tpu.dimension_semantics<arbitrary>], iteration_bounds = array<i64: 2, 1, 1>, scalar_prefetch = 0 : i64, scratch_operands = 0 : i64, tpu.core_type = #tpu.core_type<tc>, window_params = [{transform_indices = @transform_0, window_bounds = array<i64: 1, 2, 128>}, {transform_indices = @transform_1, window_bounds = array<i64: 1, 8, 2, 128>}, {transform_indices = @transform_2, window_bounds = array<i64: 1, 8, 128>}]} {
    %c0_i32 = arith.constant 0 : i32
    %0 = arith.cmpi eq, %arg2, %c0_i32 : i32
    %1 = arith.extui %0 : i1 to i32
    %c0_i32_0 = arith.constant 0 : i32
    %2 = arith.cmpi ne, %1, %c0_i32_0 : i32
    scf.if %2 {
      %cst_12 = arith.constant 0.000000e+00 : f32
      %18 = vector.broadcast %cst_12 : f32 to vector<1x8x128xf32>
      %c0_13 = arith.constant 0 : index
      %c0_14 = arith.constant 0 : index
      %c0_15 = arith.constant 0 : index
      %19 = vector.load %arg5[%c0_13, %c0_14, %c0_15] : memref<1x8x128xf32, #tpu.memory_space<vmem>>, vector<1x8x128xf32>
      tpu.vector_store %arg5[%c0_13, %c0_14, %c0_15], %18 {strides = array<i32>} : memref<1x8x128xf32, #tpu.memory_space<vmem>>, vector<1x8x128xf32>,
    } else {
    }
    %c2_i32 = arith.constant 2 : i32
    %3 = arith.muli %arg2, %c2_i32 : i32
    %4 = tpu.assume_multiple %3, 2 : i32
    %c0 = arith.constant 0 : index
    %5 = arith.index_cast %4 : i32 to index
    %c0_1 = arith.constant 0 : index
    %6 = vector.load %arg3[%c0, %5, %c0_1] : memref<1x2x128xf32, #tpu.memory_space<vmem>>, vector<1x2x128xf32>
    %7 = vector.shape_cast %6 : vector<1x2x128xf32> to vector<2x128xf32>
    %c0_2 = arith.constant 0 : index
    %c0_3 = arith.constant 0 : index
    %c0_4 = arith.constant 0 : index
    %c0_5 = arith.constant 0 : index
    %8 = vector.load %arg4[%c0_2, %c0_3, %c0_4, %c0_5] : memref<1x8x2x128xf32, #tpu.memory_space<vmem>>, vector<1x8x2x128xf32>
    %9 = vector.shape_cast %8 : vector<1x8x2x128xf32> to vector<8x2x128xf32>
    %c0_6 = arith.constant 0 : index
    %c0_7 = arith.constant 0 : index
    %c0_8 = arith.constant 0 : index
    %10 = vector.load %arg5[%c0_6, %c0_7, %c0_8] : memref<1x8x128xf32, #tpu.memory_space<vmem>>, vector<1x8x128xf32>
    %11 = vector.shape_cast %7 : vector<2x128xf32> to vector<1x2x128xf32>
    %12 = vector.broadcast %11 : vector<1x2x128xf32> to vector<8x2x128xf32>
    %13 = arith.mulf %9, %12 : vector<8x2x128xf32>
    %cst = arith.constant dense<0.000000e+00> : vector<8x128xf32>
    %14 = vector.multi_reduction <add>, %13, %cst [1] : vector<8x2x128xf32> to vector<8x128xf32>
    %15 = vector.shape_cast %14 : vector<8x128xf32> to vector<1x8x128xf32>
    %16 = arith.addf %10, %15 : vector<1x8x128xf32>
    %c0_9 = arith.constant 0 : index
    %c0_10 = arith.constant 0 : index
    %c0_11 = arith.constant 0 : index
    %17 = vector.load %arg5[%c0_9, %c0_10, %c0_11] : memref<1x8x128xf32, #tpu.memory_space<vmem>>, vector<1x8x128xf32>
    tpu.vector_store %arg5[%c0_9, %c0_10, %c0_11], %16 {strides = array<i32>} : memref<1x8x128xf32, #tpu.memory_space<vmem>>, vector<1x8x128xf32>,
    return
  }
  func.func @transform_0(%arg0: i32, %arg1: i32, %arg2: i32) -> (i32, i32, i32) {
    %c0_i32 = arith.constant 0 : i32
    %c0_i32_0 = arith.constant 0 : i32
    %c0_i32_1 = arith.constant 0 : i32
    return %arg0, %c0_i32, %c0_i32_0 : i32, i32, i32
  }
  func.func @transform_1(%arg0: i32, %arg1: i32, %arg2: i32) -> (i32, i32, i32, i32) {
    %c0_i32 = arith.constant 0 : i32
    %c0_i32_0 = arith.constant 0 : i32
    return %arg0, %arg1, %arg2, %c0_i32 : i32, i32, i32, i32
  }
  func.func @transform_2(%arg0: i32, %arg1: i32, %arg2: i32) -> (i32, i32, i32) {
    %c0_i32 = arith.constant 0 : i32
    %c0_i32_0 = arith.constant 0 : i32
    return %arg0, %arg1, %c0_i32 : i32, i32, i32
  }
}

</mosaic_0001>

<bundles_post_ra>
// kernel: tpu_custom_call.1
= control target key start
LH: loop header
LB: loop body
LE: loop exit
PB: predicated region body
PF: predicated region fallthrough
CT: control target
= control target key end

     0   :  { %7 = vsyncpa [#allocation3], 0  ;;  %s886_s0 = inlined_call_operand.hbm [shape: f32[2,2,128], index: 0, kind: input, shape index: {}]   ;;  %s887_s1 = inlined_call_operand.hbm [shape: f32[2,8,2,128], index: 1, kind: input, shape index: {}]   ;;  %s888_s2 = inlined_call_operand.hbm [shape: f32[2,8,128], index: 2, kind: output, shape index: {}]  }
   0x1   :  { %9 = vsyncpa [#allocation3 + $0x1], 0 }
   0x2   :  { %10 = vsyncpa [#allocation6], 0 }
   0x3   :  { %12 = vsyncpa [#allocation6 + $0x1], 0 }
   0x4   :  { %13 = vsyncpa [#allocation4], 0 }
   0x5   :  { %15 = vsyncpa [#allocation4 + $0x1], 0  ;;  %s711_s9 = smov 0   ;;  %s713_s10 = smov 0  }
   0x6   :  { %s715_s11 = smov 0   ;;  %s717_s12 = smov 0  }
   0x7   :  { %s719_s13 = smov 0   ;;  %s721_s14 = smov 0  }
   0x8 LB: > { %s461_s15 = sadd.s32 4294967295, %s689_s14   ;;  %s462_s16 = sadd.s32 4294967294, %s689_s14   ;;  %s689_s14 = sphi %s721_s14, %s21_s14   ;;  %s685_s13 = sphi %s719_s13, %s900_s13   ;;  %s681_s12 = sphi %s717_s12, %s899_s12   ;;  %s677_s11 = sphi %s715_s11, %s898_s11   ;;  %s673_s10 = sphi %s713_s10, %s897_s10   ;;  %s669_s9 = sphi %s711_s9, %s896_s9  }
   0x9   : > { %s40_s17 = sadd.s32 1, %s685_s13  ;;  %s47_s18 = sadd.s32 1, %s677_s11 }
   0xa   : > { %p42_p0 = scmp.ge.s32.totalorder %s40_s17, 2  ;;  %p54_p1 = scmp.ne.s32.totalorder %s677_s11, %s673_s10 }
   0xb   : > { %p55_p2 = scmp.eq.s32.totalorder %s689_s14, 0  ;;  %p60_p3 = scmp.ne.s32.totalorder %s673_s10, %s669_s9 }
   0xc   : > { %s902_s17 = smov (%p42_p0, %s40_s17), 0  ;;  %p61_p5 = scmp.eq.s32.totalorder %s461_s15, 0 }
   0xd   : > { %p752_p4 = por %p55_p2, %p54_p1  ;;  %s44_s20 = ssub.s32 %s685_s13, %s902_s17 }
   0xe   : > { %p116_p6 = scmp.eq.s32.totalorder %s461_s15, 1  ;;  %p45_p7 = scmp.eq.s32.totalorder %s44_s20, 0 }
   0xf   : > { %p758_p8 = por %p61_p5, %p60_p3  ;;  %p122_p10 = scmp.eq.s32.totalorder %s462_s16, 1 }
  0x10   : > { %p762_p9 = por %p116_p6, %p54_p1  ;;  %p496_p13 = scmp.lt.s32.totalorder %s689_s14, 2 }
  0x11   : > { %s767_s23 = scalar_select %p45_p7, %s677_s11, %s47_s18  }
  0x12   : > { %p769_p11 = por %p122_p10, %p60_p3  ;;  %s776_s25 = sand.u32 1, %s677_s11  }
  0x13   : > { %s465_s26 = sshll.u32 %s776_s25, 1  ;;  %s466_s27 = sshll.u32 %s685_s13, 5 }
  0x14   : > { %s151_s30 = scalar_lea.hbm %s886_s0, %s466_s27  ;;  %s146_s3 = scalar_lea.vmem [#allocation2], %s465_s26 }
  0x15   : > { %s153_s4 = sshll.u32 %s146_s3, 4  ;;  %p785_p0 = pnand %p496_p13, %p752_p4  ;;  %s154_s4 = int_to_ptr.vmem [resolvable:$true] %s153_s4 }
  0x16   : > { %p470_p1 = scmp.ge.s32.totalorder %s689_s14, 1  ;;  %p182_p2 = scmp.lt.s32.totalorder %s689_s14, 3 }
  0x17   : > { %s143_s6 = scalar_lea.sflag [#allocation3], %s776_s25  ;;  %p551_p3 = pneg %p785_p0 }
  0x18   : > { %s562_s7 = scalar_lea.vmem %s154_s4, 32  ;;  %s691_s8 = smov [#allocation2]  }
  0x19   : > { %p563_p5 = scmp.ne.s32.totalorder %s154_s4, %s562_s7  ;;  %s567_s15 = sshll.u32 %s691_s8, 4  ;;  %s568_s15 = int_to_ptr.vmem [resolvable:$false] %s567_s15 }
  0x1a   : > { %s569_s16 = scalar_lea.vmem %s568_s15, 64  ;;  %p570_p4 = scmp.lt.s32.totalorder %s154_s4, %s568_s15 }
  0x1b   : > { %p565_p6 = pnand %p563_p5, %p551_p3  ;;  %p571_p10 = scmp.lt.s32.totalorder %s569_s16, %s562_s7 }
  0x1d   : > { %p566_p7 = pneg %p565_p6  ;;  %p572_p13 = por %p571_p10, %p570_p4 }
  0x1f   : > { %p573_p12 = pnand %p572_p13, %p566_p7 }
  0x21   : > { %576 = shalt.err (!%p573_p12)
}
  0x22   : > { %488 = dma.hbm_to_vmem [thread:$0]  (!%p785_p0), %s151_s30, 32, %s154_s4, %s143_s6  }
  0x23   : > { %p803_p5 = pnand %p470_p1, %p182_p2  ;;  %s467_s19 = sshll.u32 %s776_s25, 4 }
  0x24   : > { %s478_s20 = sshll.u32 %s685_s13, 8  ;;  %s164_s29 = scalar_lea.vmem [#allocation5], %s467_s19 }
  0x25   : > { %s173_s28 = scalar_lea.hbm %s887_s1, %s478_s20  ;;  %s174_s3 = sshll.u32 %s164_s29, 4  ;;  %s175_s3 = int_to_ptr.vmem [resolvable:$true] %s174_s3 }
  0x26   : > { %s161_s7 = scalar_lea.sflag [#allocation6], %s776_s25  ;;  %s590_s8 = scalar_lea.vmem %s175_s3, 256 }
  0x27   : > { %p591_p12 = scmp.ne.s32.totalorder %s175_s3, %s590_s8  ;;  %s692_s30 = smov [#allocation5]  }
  0x28   : > { %s595_s4 = sshll.u32 %s692_s30, 4  ;;  %s596_s4 = int_to_ptr.vmem [resolvable:$false] %s595_s4 }
  0x29   : > { %p593_p6 = pnand %p591_p12, %p551_p3  ;;  %s597_s6 = scalar_lea.vmem %s596_s4, 512 }
  0x2a   : > { %p598_p1 = scmp.lt.s32.totalorder %s175_s3, %s596_s4  ;;  %p599_p2 = scmp.lt.s32.totalorder %s597_s6, %s590_s8 }
  0x2b   : > { %p594_p7 = pneg %p593_p6 }
  0x2c   : > { %p600_p4 = por %p599_p2, %p598_p1 }
  0x2e   : > { %p601_p10 = pnand %p600_p4, %p594_p7 }
  0x30   : > { %604 = shalt.err (!%p601_p10)
}
  0x31   : > { %s693_s15 = smov 32   ;;  %s694_s16 = smov 2  }
  0x32   : > { %491 = dma.hbm_to_vmem [thread:$0]  (!%p785_p0), %s173_s28, 256, %s175_s3, %s161_s7, %s693_s15, %s693_s15, %s694_s16  }
  0x33   : > { %186 = sbr.rel (%p803_p5) target bundleno = 97 (0x61), region = 28  ;;  %s821_s25 = sand.u32 (!%p803_p5), 1, %s673_s10  }
  0x34   : > { %s471_s19 = sshll.u32 (!%p803_p5), %s821_s25, 1  ;;  %s189_s20 = scalar_lea.sflag (!%p803_p5), [#allocation3], %s821_s25 }
  0x35   : > { %s192_s26 = scalar_lea.vmem (!%p803_p5), [#allocation2], %s471_s19 }
  0x38   : > { %656 = dma.done.wait (%p758_p8), %s189_s20, 32  }
  0x39   : > { %658 = vsyncadd (%p758_p8), %s189_s20, 4294967264  ;;  %s472_s5 = sshll.u32 %s821_s25, 4  ;;  %s198_s18 = scalar_lea.sflag [#allocation6], %s821_s25 }
  0x3a   : > { %s201_s27 = scalar_lea.vmem [#allocation5], %s472_s5 }
  0x3b   : > { %660 = dma.done.wait (%p758_p8), %s198_s18, 256  }
  0x3c   : > { %662 = vsyncadd (%p758_p8), %s198_s18, 4294967040  ;;  %vm253_vm0 = vcmask 1041408   ;;  %v235_v0 = vld [vmem:[%s192_s26] sm:$0x3]  ;;  %v236_v1 = vld [vmem:[%s201_s27] sm:$0x3] }
  0x3d   : > { %v237_v2 = vld [vmem:[%s201_s27 + $0x2] sm:$0x3]  ;;  %v238_v3 = vld [vmem:[%s201_s27 + $0x4] sm:$0x3]  ;;  %v239_v4 = vld [vmem:[%s201_s27 + $0x6] sm:$0x3]  ;;  %v245_v6 = vmul.f32 %v236_v1, %v235_v0 }
  0x3e   : > { %v240_v5 = vld [vmem:[%s201_s27 + $0x8] sm:$0x3]  ;;  %v246_v7 = vmul.f32 %v237_v2, %v235_v0  ;;  %v241_v8 = vld [vmem:[%s201_s27 + $0xa] sm:$0x3]  ;;  %v242_v9 = vld [vmem:[%s201_s27 + $0xc] sm:$0x3]  ;;  %v247_v11 = vmul.f32 %v238_v3, %v235_v0  ;;  %v248_v12 = vmul.f32 %v239_v4, %v235_v0 }
  0x3f   : > { %v243_v10 = vld [vmem:[%s201_s27 + $0xe] sm:$0x3]  ;;  %v249_v13 = vmul.f32 %v240_v5, %v235_v0  ;;  %v250_v14 = vmul.f32 %v241_v8, %v235_v0  ;;  %v251_v15 = vmul.f32 %v242_v9, %v235_v0  ;;  %v254_v17 = vsel %vm253_vm0, %v245_v6, 0.0  ;;  %s473_s21 = sshll.u32 %s821_s25, 3  ;;  %s475_s28 = sshll.u32 %s681_s12, 7 }
  0x40   : > { %v252_v16 = vmul.f32 %v243_v10, %v235_v0  ;;  %v255_v18 = vrot.slane %v254_v17, 4  ;;  %v261_v19 = vsel %vm253_vm0, %v246_v7, 0.0  ;;  %v268_v20 = vsel %vm253_vm0, %v247_v11, 0.0  ;;  %s226_s29 = scalar_lea.vmem [#allocation7], %s473_s21  ;;  %s348_s30 = scalar_lea.hbm %s888_s2, %s475_s28 }
  0x41   : > { %v275_v21 = vsel %vm253_vm0, %v248_v12, 0.0  ;;  %v262_v22 = vrot.slane %v261_v19, 4  ;;  %v269_v23 = vrot.slane %v268_v20, 4  ;;  %v282_v25 = vsel %vm253_vm0, %v249_v13, 0.0  ;;  %s350_s3 = sshll.u32 %s226_s29, 4  ;;  %s336_s4 = scalar_lea.sflag [#allocation4], %s821_s25  ;;  %s351_s3 = int_to_ptr.vmem [resolvable:$true] %s350_s3 }
  0x42   : > { %v276_v24 = vrot.slane %v275_v21, 4  ;;  %v256_v26 = vadd.f32 %v255_v18, %v254_v17  ;;  %v283_v27 = vrot.slane %v282_v25, 4  ;;  %v289_v28 = vsel %vm253_vm0, %v250_v14, 0.0  ;;  %s605_s6 = scalar_lea.vmem %s351_s3, 128  ;;  %s695_s15 = smov [#allocation7]  }
  0x43   : > { %v296_v29 = vsel %vm253_vm0, %v251_v15, 0.0  ;;  %vm318_vm1 = vcmask 1041409   ;;  %v263_v30 = vadd.f32 %v262_v22, %v261_v19  ;;  %v270_v31 = vadd.f32 %v269_v23, %v268_v20  ;;  %p606_p8 = scmp.ne.s32.totalorder %s351_s3, %s605_s6  ;;  %s609_s16 = sshll.u32 %s695_s15, 4  ;;  %s610_s16 = int_to_ptr.vmem [resolvable:$false] %s609_s16 }
  0x44   : > { %v277_v32 = vadd.f32 %v276_v24, %v275_v21  ;;  %v290_v33 = vrot.slane %v289_v28, 4  ;;  %vm320_vm2 = vcmask 1042434   ;;  %v257_v34 = vrot.slane %v256_v26, 2  ;;  %s611_s12 = scalar_lea.vmem %s610_s16, 256  ;;  %p612_p13 = scmp.lt.s32.totalorder %s351_s3, %s610_s16 }
  0x45   : > { %v284_v35 = vadd.f32 %v283_v27, %v282_v25  ;;  %v297_v36 = vrot.slane %v296_v29, 4  ;;  %v303_v37 = vsel %vm253_vm0, %v252_v16, 0.0  ;;  %v264_v38 = vrot.slane %v263_v30, 2  ;;  %p607_p0 = pnand %p606_p8, %p762_p9  ;;  %p613_p5 = scmp.lt.s32.totalorder %s611_s12, %s605_s6 }
  0x46   : > { %v271_v39 = vrot.slane %v270_v31, 2  ;;  %v278_v40 = vrot.slane %v277_v32, 2  ;;  %v291_v41 = vadd.f32 %v290_v33, %v289_v28  ;;  %v258_v42 = vadd.f32 %v257_v34, %v256_v26 }
  0x47   : > { %v285_v43 = vrot.slane %v284_v35, 2  ;;  %v298_v44 = vadd.f32 %v297_v36, %v296_v29  ;;  %v304_v45 = vrot.slane %v303_v37, 4  ;;  %v265_v46 = vadd.f32 %v264_v38, %v263_v30  ;;  %p608_p3 = pneg %p607_p0  ;;  %p614_p12 = por %p613_p5, %p612_p13 }
  0x48   : > { %v272_v47 = vadd.f32 %v271_v39, %v270_v31  ;;  %v279_v48 = vadd.f32 %v278_v40, %v277_v32  ;;  %v292_v49 = vrot.slane %v291_v41, 2  ;;  %v259_v50 = vrot.slane %v258_v42, 1 }
  0x49   : > { %v286_v51 = vadd.f32 %v285_v43, %v284_v35  ;;  %v299_v52 = vrot.slane %v298_v44, 2  ;;  %v305_v53 = vadd.f32 %v304_v45, %v303_v37  ;;  %v266_v54 = vrot.slane %v265_v46, 1  ;;  %p615_p6 = pnand %p614_p12, %p608_p3 }
  0x4a   : > { %v273_v55 = vrot.slane %v272_v47, 1  ;;  %v280_v56 = vrot.slane %v279_v48, 1  ;;  %v293_v57 = vadd.f32 %v292_v49, %v291_v41  ;;  %v260_v58 = vadd.f32 %v259_v50, %v258_v42 }
  0x4b   : > { %v287_v59 = vrot.slane %v286_v51, 1  ;;  %v300_v60 = vadd.f32 %v299_v52, %v298_v44  ;;  %v306_v61 = vrot.slane %v305_v53, 2  ;;  %v267_v62 = vadd.f32 %v266_v54, %v265_v46 }
  0x4c   : > { %v274_v63 = vadd.f32 %v273_v55, %v272_v47  ;;  %v281_v0 = vadd.f32 %v280_v56, %v279_v48  ;;  %v294_v1 = vrot.slane %v293_v57, 1  ;;  %vm322_vm3 = vcmask 1043459  }
  0x4d   : > { %v288_v2 = vadd.f32 %v287_v59, %v286_v51  ;;  %v301_v3 = vrot.slane %v300_v60, 1  ;;  %v307_v4 = vadd.f32 %v306_v61, %v305_v53  ;;  %v319_v6 = vsel %vm318_vm1, %v267_v62, %v260_v58 }
  0x4e   : > { %v295_v5 = vadd.f32 %v294_v1, %v293_v57  ;;  %vm324_vm4 = vcmask 1044484   ;;  %v321_v9 = vsel %vm320_vm2, %v274_v63, %v319_v6  ;;  %vm326_vm5 = vcmask 1045509  }
  0x4f   : > { %v302_v7 = vadd.f32 %v301_v3, %v300_v60  ;;  %v308_v8 = vrot.slane %v307_v4, 1  ;;  %v323_v10 = vsel %vm322_vm3, %v281_v0, %v321_v9  ;;  %vm328_vm6 = vcmask 1046534  }
  0x50   : > { %v325_v12 = vsel %vm324_vm4, %v288_v2, %v323_v10  ;;  %vm330_vm7 = vcmask 1047559  }
  0x51   : > { %v309_v11 = vadd.f32 %v308_v8, %v307_v4  ;;  %v327_v13 = vsel %vm326_vm5, %v295_v5, %v325_v12 }
  0x52   : > { %v329_v14 = vsel %vm328_vm6, %v302_v7, %v327_v13 }
  0x53   : > { %v331_v15 = vsel %vm330_vm7, %v309_v11, %v329_v14 }
  0x54   : > { %334 = vst [vmem:[%s226_s29] sm:$0xff] %v331_v15 }
  0x55   : > { %618 = shalt.err (!%p615_p6)
}
  0x56   : > { %s619_s19 = scalar_lea.hbm %s348_s30, 128  ;;  %s623_s26 = scalar_lea.hbm %s888_s2, 256 }
  0x57   : > { %p620_p7 = scmp.ne.s32.totalorder %s348_s30, %s619_s19  ;;  %p624_p4 = scmp.lt.s32.totalorder %s348_s30, %s888_s2 }
  0x58   : > { %p625_p10 = scmp.lt.s32.totalorder %s623_s26, %s619_s19 }
  0x59   : > { %p621_p1 = pnand %p620_p7, %p762_p9 }
  0x5a   : > { %p626_p8 = por %p625_p10, %p624_p4 }
  0x5b   : > { %p622_p2 = pneg %p621_p1 }
  0x5d   : > { %p627_p0 = pnand %p626_p8, %p622_p2 }
  0x5f   : > { %630 = shalt.err (!%p627_p0)
}
  0x60   : > { %483 = dma.vmem_to_hbm [thread:$0]  (%p762_p9), %s351_s3, 128, %s348_s30, %s336_s4  }
  0x61 PF: > { %s362_s27 = sand.u32 1, %s669_s9   ;;  %p895_p3 = scmp.ge.s32.totalorder %s689_s14, 2 }
  0x62   : > { %s363_s21 = scalar_lea.sflag [#allocation4], %s362_s27 }
  0x63   : > { %p493_p13 = pnand %p895_p3, %p769_p11 }
  0x65   : > { %p494_p5 = pneg %p493_p13 }
  0x67   : > { %664 = dma.done.wait (%p494_p5), %s363_s21, 128  }
  0x68   : > { %666 = vsyncadd (%p494_p5), %s363_s21, 4294967168  ;;  %s21_s14 = sadd.s32 1, %s689_s14   ;;  %s896_s9 = smov %s673_s10 }
  0x69   : > { %p18_p12 = scmp.ge.s32.totalorder %s21_s14, 4   ;;  %s897_s10 = smov %s677_s11 }
  0x6a   : > { %s898_s11 = smov %s767_s23  ;;  %s899_s12 = smov %s685_s13 }
  0x6b   : > { %s900_s13 = smov %s902_s17  ;;  %20 = sbr.rel (!%p18_p12) target bundleno = 8 (0x8), region = 91 }
  0x70   :  { %368 = vsyncpa [#allocation3], 1 }
  0x71   :  { %370 = vsyncpa [#allocation3 + $0x1], 1 }
  0x72   :  { %371 = vsyncpa [#allocation6], 1 }
  0x73   :  { %373 = vsyncpa [#allocation6 + $0x1], 1 }
  0x74   :  { %374 = vsyncpa [#allocation4], 1 }
  0x75   :  { %376 = vsyncpa [#allocation4 + $0x1], 1 }

</bundles_post_ra>
